<compile_context>
chip_gen: v6e
topology: v6e:2x2x1
jax: 0.10.0
libtpu: 0.0.40
codegen_flags: <defaults>
</compile_context>

<pallas_src>
import math

import jax
import jax.numpy as jnp
from jax.experimental import pallas as pl
from jax.experimental.pallas import tpu as pltpu


def _make_critic_kernel(num_layers):
    """Builds the fused kernel for an MLP with `num_layers` Linear layers."""

    def kernel(*refs):
        # refs = [state, state_avg, state_inv_std, value_std, value_avg,
        #         w_0, b_0, ..., w_{n-1}, b_{n-1}, out]
        x_ref, avg_ref, inv_ref, vstd_ref, vavg_ref = refs[:5]
        o_ref = refs[-1]
        wb_refs = refs[5:-1]

        # State normalization in f32 on the VPU (hidden under the MXU work).
        h = (x_ref[...].astype(jnp.float32) - avg_ref[...]) * inv_ref[...]

        # Linear -> ReLU chain; the final Linear has no activation (raw output).
        for li in range(num_layers):
            w_ref = wb_refs[2 * li]
            b_ref = wb_refs[2 * li + 1]
            # Cast activations to the weight dtype (f32 or bf16); accumulate f32.
            h = (
                jnp.dot(
                    h.astype(w_ref.dtype),
                    w_ref[...],
                    preferred_element_type=jnp.float32,
                )
                + b_ref[...]
            )
            if li < num_layers - 1:
                h = jnp.maximum(h, 0.0)

        # Value re-normalization:  v * value_std + value_avg.
        v = h * vstd_ref[...] + vavg_ref[...]
        o_ref[...] = v.astype(o_ref.dtype)

    return kernel


def critic_ppo_forward(
    state,
    state_avg,
    state_std,
    value_avg,
    value_std,
    weights,
    biases,
    *,
    tile_b=None,
    compute_dtype=jnp.float32,
):
    """Fused CriticPPO forward.

    state   : (B, S) float32
    weights : list of PyTorch-layout matrices, weights[i] has shape (out_i, in_i)
    biases  : list of (out_i,) vectors
    Returns : (B,) float32  == value.squeeze(1)
    """
    B, S = state.shape
    n_layers = len(weights)
    assert n_layers == len(biases) and n_layers >= 1

    # --- batch tiling: big tiles, sublane-aligned, clamp by VMEM, pad the tail --
    if tile_b is None:
        tile_b = min(512, B)
        # keep the double-buffered f32 state tile well under scoped VMEM
        tile_b = min(tile_b, max(8, (4 << 20) // max(1, 4 * S)))
    tile_b = ((max(8, tile_b) + 7) // 8) * 8
    num_tiles = pl.cdiv(B, tile_b)
    Bp = tile_b * num_tiles
    if Bp != B:
        state = jnp.pad(state, ((0, Bp - B), (0, 0)))

    # --- parameter prep (wrapper-side glue, done once) ------------------------
    avg2 = jnp.asarray(state_avg, jnp.float32).reshape(1, S)
    inv2 = (1.0 / jnp.asarray(state_std, jnp.float32)).reshape(1, S)
    vstd2 = jnp.asarray(value_std, jnp.float32).reshape(1, 1)
    vavg2 = jnp.asarray(value_avg, jnp.float32).reshape(1, 1)

    # Pre-transpose weights to (in, out) so the kernel does plain `x @ W`;
    # optionally cast to bf16 for the MXU.  Biases stay f32 (added to f32 acc).
    w_list = [jnp.asarray(w, jnp.float32).T.astype(compute_dtype) for w in weights]
    b_list = [jnp.asarray(b, jnp.float32).reshape(1, -1) for b in biases]

    in_arrays = [state, avg2, inv2, vstd2, vavg2]
    in_specs = [
        pl.BlockSpec((tile_b, S), lambda i: (i, 0)),
        pl.BlockSpec((1, S), lambda i: (0, 0)),
        pl.BlockSpec((1, S), lambda i: (0, 0)),
        pl.BlockSpec((1, 1), lambda i: (0, 0)),
        pl.BlockSpec((1, 1), lambda i: (0, 0)),
    ]
    for w, b in zip(w_list, b_list):
        in_arrays.append(w)
        in_specs.append(pl.BlockSpec(w.shape, lambda i: (0, 0)))
        in_arrays.append(b)
        in_specs.append(pl.BlockSpec(b.shape, lambda i: (0, 0)))

    out = pl.pallas_call(
        _make_critic_kernel(n_layers),
        out_shape=jax.ShapeDtypeStruct((Bp, 1), jnp.float32),
        grid_spec=pltpu.PrefetchScalarGridSpec(
            num_scalar_prefetch=0,
            grid=(num_tiles,),
            in_specs=in_specs,
            out_specs=pl.BlockSpec((tile_b, 1), lambda i: (i, 0)),
        ),
        compiler_params=pltpu.CompilerParams(
            dimension_semantics=("parallel",),
        ),
    )(*in_arrays)

    return out[:B, 0]


# ----------------------------- pure-JAX reference ------------------------------


def critic_ppo_reference(state, state_avg, state_std, value_avg, value_std, weights, biases):
    h = (state - state_avg) / state_std
    for i, (w, b) in enumerate(zip(weights, biases)):
        h = jnp.dot(h, w.T, precision=jax.lax.Precision.HIGHEST) + b
        if i < len(weights) - 1:
            h = jnp.maximum(h, 0.0)
    v = h * value_std + value_avg
    return v[:, 0]


# ----------------------------- deterministic init ------------------------------


def _init_linear(key, out_dim, in_dim):
    """Matches nn.Linear default init (kaiming-uniform-ish)."""
    kw, kb = jax.random.split(key)
    bound_w = math.sqrt(1.0 / in_dim) * math.sqrt(3.0)
    w = jax.random.uniform(kw, (out_dim, in_dim), jnp.float32, -bound_w, bound_w)
    bound_b = 1.0 / math.sqrt(in_dim)
    b = jax.random.uniform(kb, (out_dim,), jnp.float32, -bound_b, bound_b)
    return w, b


def _init_orthogonal(key, out_dim, in_dim, std=0.5, bias_const=1e-6):
    """layer_init_with_orthogonal for the final value head."""
    g = jax.random.normal(key, (in_dim, out_dim), jnp.float32)
    q, _ = jnp.linalg.qr(g)  # orthonormal columns
    w = q.T * std
    b = jnp.full((out_dim,), bias_const, jnp.float32)
    return w, b


if __name__ == "__main__":
    key = jax.random.PRNGKey(0)

    B = 10            # deliberately NOT a multiple of the tile -> exercises padding
    STATE_DIM = 24
    ACTION_DIM = 4    # unused by the critic forward
    DIMS = (64, 64)   # hidden widths of the critic MLP
    layer_dims = [STATE_DIM, *DIMS, 1]

    keys = jax.random.split(key, len(layer_dims) + 4)

    weights, biases = [], []
    for i in range(len(layer_dims) - 2):
        w, b = _init_linear(keys[i], layer_dims[i + 1], layer_dims[i])
        weights.append(w)
        biases.append(b)
    w_last, b_last = _init_orthogonal(keys[len(layer_dims) - 2], 1, layer_dims[-2], std=0.5)
    weights.append(w_last)
    biases.append(b_last)

    state = jax.random.normal(keys[-4], (B, STATE_DIM), jnp.float32) * 2.0 + 0.5
    state_avg = jax.random.normal(keys[-3], (STATE_DIM,), jnp.float32) * 0.1
    state_std = 1.0 + jnp.abs(jax.random.normal(keys[-2], (STATE_DIM,), jnp.float32)) * 0.2
    value_avg = jnp.array(0.3, jnp.float32)
    value_std = jnp.array(1.7, jnp.float32)

    ref = critic_ppo_reference(state, state_avg, state_std, value_avg, value_std, weights, biases)

    # f32 compute path (strict check).
    out = critic_ppo_forward(
        state, state_avg, state_std, value_avg, value_std, weights, biases
    )
    out = jax.block_until_ready(out)
    assert out.shape == (B,), out.shape
    assert jnp.allclose(out, ref, atol=1e-4, rtol=1e-4), "f32 kernel mismatch vs reference"

    # bf16 weights/activations with f32 accumulation (v6e/v7x MXU-native path).
    out_bf16 = critic_ppo_forward(
        state, state_avg, state_std, value_avg, value_std, weights, biases,
        compute_dtype=jnp.bfloat16,
    )
    out_bf16 = jax.block_until_ready(out_bf16)
    assert out_bf16.shape == (B,), out_bf16.shape
    assert jnp.allclose(out_bf16, ref, atol=1e-1, rtol=1e-1), "bf16 kernel drifted too far"

    # Larger batch that spans several tiles with a ragged tail (pipelined path).
    B2 = 1234
    state2 = jax.random.normal(keys[-1], (B2, STATE_DIM), jnp.float32)
    ref2 = critic_ppo_reference(state2, state_avg, state_std, value_avg, value_std, weights, biases)
    out2 = critic_ppo_forward(
        state2, state_avg, state_std, value_avg, value_std, weights, biases, tile_b=512
    )
    out2 = jax.block_until_ready(out2)
    assert out2.shape == (B2,), out2.shape
    assert jnp.allclose(out2, ref2, atol=1e-4, rtol=1e-4), "tiled kernel mismatch vs reference"

    print("KERNEL_OK")
</pallas_src>

<mosaic_0001>
module attributes {stable_mosaic.version = 11 : i64} {
  func.func @kernel(%arg0: i32, %arg1: memref<16x24xf32, #tpu.memory_space<vmem>>, %arg2: memref<1x24xf32, #tpu.memory_space<vmem>>, %arg3: memref<1x24xf32, #tpu.memory_space<vmem>>, %arg4: memref<1x1xf32, #tpu.memory_space<vmem>>, %arg5: memref<1x1xf32, #tpu.memory_space<vmem>>, %arg6: memref<24x64xf32, #tpu.memory_space<vmem>>, %arg7: memref<1x64xf32, #tpu.memory_space<vmem>>, %arg8: memref<64x64xf32, #tpu.memory_space<vmem>>, %arg9: memref<1x64xf32, #tpu.memory_space<vmem>>, %arg10: memref<64x1xf32, #tpu.memory_space<vmem>>, %arg11: memref<1x1xf32, #tpu.memory_space<vmem>>, %arg12: memref<16x1xf32, #tpu.memory_space<vmem>>) attributes {dimension_semantics = [#tpu.dimension_semantics<parallel>], iteration_bounds = array<i64: 1>, scalar_prefetch = 0 : i64, scratch_operands = 0 : i64, tpu.core_type = #tpu.core_type<tc>, window_params = [{transform_indices = @transform_0, window_bounds = array<i64: 16, 24>}, {pipeline_mode = #tpu.pipeline_mode<synchronous>, transform_indices = @transform_1, window_bounds = array<i64: 1, 24>}, {pipeline_mode = #tpu.pipeline_mode<synchronous>, transform_indices = @transform_2, window_bounds = array<i64: 1, 24>}, {pipeline_mode = #tpu.pipeline_mode<synchronous>, transform_indices = @transform_3, window_bounds = array<i64: 1, 1>}, {pipeline_mode = #tpu.pipeline_mode<synchronous>, transform_indices = @transform_4, window_bounds = array<i64: 1, 1>}, {pipeline_mode = #tpu.pipeline_mode<synchronous>, transform_indices = @transform_5, window_bounds = array<i64: 24, 64>}, {pipeline_mode = #tpu.pipeline_mode<synchronous>, transform_indices = @transform_6, window_bounds = array<i64: 1, 64>}, {pipeline_mode = #tpu.pipeline_mode<synchronous>, transform_indices = @transform_7, window_bounds = array<i64: 64, 64>}, {pipeline_mode = #tpu.pipeline_mode<synchronous>, transform_indices = @transform_8, window_bounds = array<i64: 1, 64>}, {pipeline_mode = #tpu.pipeline_mode<synchronous>, transform_indices = @transform_9, window_bounds = array<i64: 64, 1>}, {pipeline_mode = #tpu.pipeline_mode<synchronous>, transform_indices = @transform_10, window_bounds = array<i64: 1, 1>}, {transform_indices = @transform_11, window_bounds = array<i64: 16, 1>}]} {
    %c0 = arith.constant 0 : index
    %c0_0 = arith.constant 0 : index
    %0 = vector.load %arg1[%c0, %c0_0] : memref<16x24xf32, #tpu.memory_space<vmem>>, vector<16x24xf32>
    %c0_1 = arith.constant 0 : index
    %c0_2 = arith.constant 0 : index
    %1 = vector.load %arg2[%c0_1, %c0_2] : memref<1x24xf32, #tpu.memory_space<vmem>>, vector<1x24xf32>
    %2 = vector.broadcast %1 : vector<1x24xf32> to vector<16x24xf32>
    %3 = arith.subf %0, %2 : vector<16x24xf32>
    %c0_3 = arith.constant 0 : index
    %c0_4 = arith.constant 0 : index
    %4 = vector.load %arg3[%c0_3, %c0_4] : memref<1x24xf32, #tpu.memory_space<vmem>>, vector<1x24xf32>
    %5 = vector.broadcast %4 : vector<1x24xf32> to vector<16x24xf32>
    %6 = arith.mulf %3, %5 : vector<16x24xf32>
    %c0_5 = arith.constant 0 : index
    %c0_6 = arith.constant 0 : index
    %7 = vector.load %arg6[%c0_5, %c0_6] : memref<24x64xf32, #tpu.memory_space<vmem>>, vector<24x64xf32>
    %cst = arith.constant dense<0.000000e+00> : vector<16x64xf32>
    %8 = tpu.matmul %6, %7, %cst {dimension_numbers = #tpu.dot_dimension_numbers<[1], [0], [0], [1], [0, 0, 1, 1], [], []>} : vector<16x24xf32>, vector<24x64xf32>, vector<16x64xf32> -> vector<16x64xf32>
    %c0_7 = arith.constant 0 : index
    %c0_8 = arith.constant 0 : index
    %9 = vector.load %arg7[%c0_7, %c0_8] : memref<1x64xf32, #tpu.memory_space<vmem>>, vector<1x64xf32>
    %10 = vector.broadcast %9 : vector<1x64xf32> to vector<16x64xf32>
    %11 = arith.addf %8, %10 : vector<16x64xf32>
    %cst_9 = arith.constant 0.000000e+00 : f32
    %12 = vector.broadcast %cst_9 : f32 to vector<16x64xf32>
    %13 = arith.maximumf %11, %12 : vector<16x64xf32>
    %c0_10 = arith.constant 0 : index
    %c0_11 = arith.constant 0 : index
    %14 = vector.load %arg8[%c0_10, %c0_11] : memref<64x64xf32, #tpu.memory_space<vmem>>, vector<64x64xf32>
    %cst_12 = arith.constant dense<0.000000e+00> : vector<16x64xf32>
    %15 = tpu.matmul %13, %14, %cst_12 {dimension_numbers = #tpu.dot_dimension_numbers<[1], [0], [0], [1], [0, 0, 1, 1], [], []>} : vector<16x64xf32>, vector<64x64xf32>, vector<16x64xf32> -> vector<16x64xf32>
    %c0_13 = arith.constant 0 : index
    %c0_14 = arith.constant 0 : index
    %16 = vector.load %arg9[%c0_13, %c0_14] : memref<1x64xf32, #tpu.memory_space<vmem>>, vector<1x64xf32>
    %17 = vector.broadcast %16 : vector<1x64xf32> to vector<16x64xf32>
    %18 = arith.addf %15, %17 : vector<16x64xf32>
    %cst_15 = arith.constant 0.000000e+00 : f32
    %19 = vector.broadcast %cst_15 : f32 to vector<16x64xf32>
    %20 = arith.maximumf %18, %19 : vector<16x64xf32>
    %c0_16 = arith.constant 0 : index
    %c0_17 = arith.constant 0 : index
    %21 = vector.load %arg10[%c0_16, %c0_17] : memref<64x1xf32, #tpu.memory_space<vmem>>, vector<64x1xf32>
    %cst_18 = arith.constant dense<0.000000e+00> : vector<16x1xf32>
    %22 = tpu.matmul %20, %21, %cst_18 {dimension_numbers = #tpu.dot_dimension_numbers<[1], [0], [0], [1], [0, 0, 1, 1], [], []>} : vector<16x64xf32>, vector<64x1xf32>, vector<16x1xf32> -> vector<16x1xf32>
    %c0_19 = arith.constant 0 : index
    %c0_20 = arith.constant 0 : index
    %23 = vector.load %arg11[%c0_19, %c0_20] : memref<1x1xf32, #tpu.memory_space<vmem>>, vector<1x1xf32>
    %24 = vector.broadcast %23 : vector<1x1xf32> to vector<16x1xf32>
    %25 = arith.addf %22, %24 : vector<16x1xf32>
    %c0_21 = arith.constant 0 : index
    %c0_22 = arith.constant 0 : index
    %26 = vector.load %arg4[%c0_21, %c0_22] : memref<1x1xf32, #tpu.memory_space<vmem>>, vector<1x1xf32>
    %27 = vector.broadcast %26 : vector<1x1xf32> to vector<16x1xf32>
    %28 = arith.mulf %25, %27 : vector<16x1xf32>
    %c0_23 = arith.constant 0 : index
    %c0_24 = arith.constant 0 : index
    %29 = vector.load %arg5[%c0_23, %c0_24] : memref<1x1xf32, #tpu.memory_space<vmem>>, vector<1x1xf32>
    %30 = vector.broadcast %29 : vector<1x1xf32> to vector<16x1xf32>
    %31 = arith.addf %28, %30 : vector<16x1xf32>
    %c0_25 = arith.constant 0 : index
    %c0_26 = arith.constant 0 : index
    %32 = vector.load %arg12[%c0_25, %c0_26] : memref<16x1xf32, #tpu.memory_space<vmem>>, vector<16x1xf32>
    tpu.vector_store %arg12[%c0_25, %c0_26], %31 {strides = array<i32>} : memref<16x1xf32, #tpu.memory_space<vmem>>, vector<16x1xf32>,
    return
  }
  func.func @transform_0(%arg0: i32) -> (i32, i32) {
    %c0_i32 = arith.constant 0 : i32
    %c0_i32_0 = arith.constant 0 : i32
    return %arg0, %c0_i32 : i32, i32
  }
  func.func @transform_1(%arg0: i32) -> (i32, i32) {
    %c0_i32 = arith.constant 0 : i32
    %c0_i32_0 = arith.constant 0 : i32
    %c0_i32_1 = arith.constant 0 : i32
    return %c0_i32, %c0_i32_0 : i32, i32
  }
  func.func @transform_2(%arg0: i32) -> (i32, i32) {
    %c0_i32 = arith.constant 0 : i32
    %c0_i32_0 = arith.constant 0 : i32
    %c0_i32_1 = arith.constant 0 : i32
    return %c0_i32, %c0_i32_0 : i32, i32
  }
  func.func @transform_3(%arg0: i32) -> (i32, i32) {
    %c0_i32 = arith.constant 0 : i32
    %c0_i32_0 = arith.constant 0 : i32
    %c0_i32_1 = arith.constant 0 : i32
    return %c0_i32, %c0_i32_0 : i32, i32
  }
  func.func @transform_4(%arg0: i32) -> (i32, i32) {
    %c0_i32 = arith.constant 0 : i32
    %c0_i32_0 = arith.constant 0 : i32
    %c0_i32_1 = arith.constant 0 : i32
    return %c0_i32, %c0_i32_0 : i32, i32
  }
  func.func @transform_5(%arg0: i32) -> (i32, i32) {
    %c0_i32 = arith.constant 0 : i32
    %c0_i32_0 = arith.constant 0 : i32
    %c0_i32_1 = arith.constant 0 : i32
    return %c0_i32, %c0_i32_0 : i32, i32
  }
  func.func @transform_6(%arg0: i32) -> (i32, i32) {
    %c0_i32 = arith.constant 0 : i32
    %c0_i32_0 = arith.constant 0 : i32
    %c0_i32_1 = arith.constant 0 : i32
    return %c0_i32, %c0_i32_0 : i32, i32
  }
  func.func @transform_7(%arg0: i32) -> (i32, i32) {
    %c0_i32 = arith.constant 0 : i32
    %c0_i32_0 = arith.constant 0 : i32
    %c0_i32_1 = arith.constant 0 : i32
    return %c0_i32, %c0_i32_0 : i32, i32
  }
  func.func @transform_8(%arg0: i32) -> (i32, i32) {
    %c0_i32 = arith.constant 0 : i32
    %c0_i32_0 = arith.constant 0 : i32
    %c0_i32_1 = arith.constant 0 : i32
    return %c0_i32, %c0_i32_0 : i32, i32
  }
  func.func @transform_9(%arg0: i32) -> (i32, i32) {
    %c0_i32 = arith.constant 0 : i32
    %c0_i32_0 = arith.constant 0 : i32
    %c0_i32_1 = arith.constant 0 : i32
    return %c0_i32, %c0_i32_0 : i32, i32
  }
  func.func @transform_10(%arg0: i32) -> (i32, i32) {
    %c0_i32 = arith.constant 0 : i32
    %c0_i32_0 = arith.constant 0 : i32
    %c0_i32_1 = arith.constant 0 : i32
    return %c0_i32, %c0_i32_0 : i32, i32
  }
  func.func @transform_11(%arg0: i32) -> (i32, i32) {
    %c0_i32 = arith.constant 0 : i32
    %c0_i32_0 = arith.constant 0 : i32
    return %arg0, %c0_i32 : i32, i32
  }
}

</mosaic_0001>

<bundles_post_ra>
// kernel: tpu_custom_call.1
= control target key start
LH: loop header
LB: loop body
LE: loop exit
PB: predicated region body
PF: predicated region fallthrough
CT: control target
= control target key end

     0   :  { %s794_s0 = inlined_call_operand.vmem [shape: f32[16,24], index: 0, kind: input, shape index: {}]   ;;  %s795_s1 = inlined_call_operand.hbm [shape: f32[1,24], index: 1, kind: input, shape index: {}]   ;;  %s796_s2 = inlined_call_operand.hbm [shape: f32[1,24], index: 2, kind: input, shape index: {}]   ;;  %s797_s3 = inlined_call_operand.<no memory space> [shape: f32[1,1], index: 3, kind: input, shape index: {}]   ;;  %s798_s5 = inlined_call_operand.hbm [shape: f32[24,64], index: 5, kind: input, shape index: {}]   ;;  %s799_s6 = inlined_call_operand.hbm [shape: f32[1,64], index: 6, kind: input, shape index: {}]   ;;  %s800_s7 = inlined_call_operand.vmem [shape: f32[64,64], index: 7, kind: input, shape index: {}]   ;;  %s801_s8 = inlined_call_operand.hbm [shape: f32[1,64], index: 8, kind: input, shape index: {}]   ;;  %s802_s9 = inlined_call_operand.vmem [shape: f32[64,1], index: 9, kind: input, shape index: {}]   ;;  %s803_s11 = inlined_call_operand.vmem [shape: f32[16,1], index: 11, kind: output, shape index: {}]   ;;  %s804_s4 = inlined_call_operand.<no memory space> [shape: f32[1,1], index: 4, kind: input, shape index: {}]   ;;  %s805_s10 = inlined_call_operand.<no memory space> [shape: f32[1,1], index: 10, kind: input, shape index: {}]  }
   0x1   :  { %v16_v0 = vstv %s797_s3  ;;  %v18_v1 = vstv %s804_s4  ;;  %v20_v2 = vstv %s805_s10 }
   0x2   :  { %17 = vst [vmem:[#allocation2] sm:$0x1] %v16_v0  ;;  %19 = vst [vmem:[#allocation3] sm:$0x1] %v18_v1 }
   0x3   :  { %21 = vst [vmem:[#allocation4] sm:$0x1] %v20_v2 }
   0x4   :  { %22 = vsyncpa [#allocation6], 0 }
   0x5   :  { %23 = vsyncpa [#allocation8], 0 }
   0x6   :  { %24 = vsyncpa [#allocation11], 0  ;;  %s639_s23 = smov [#allocation7]   ;;  %s640_s25 = smov [#allocation10]  }
   0x7   :  { %s43_s24 = sshll.u32 %s639_s23, 4  ;;  %s69_s26 = sshll.u32 %s640_s25, 4  ;;  %s44_s24 = int_to_ptr.vmem [resolvable:$true] %s43_s24  ;;  %s70_s26 = int_to_ptr.vmem [resolvable:$true] %s69_s26 }
   0x8   :  { %s541_s3 = scalar_lea.vmem %s44_s24, 16  ;;  %s545_s27 = scalar_lea.vmem %s44_s24, 32 }
   0x9   :  { %p542_p0 = scmp.ne.s32.totalorder %s44_s24, %s541_s3  ;;  %p546_p1 = scmp.lt.s32.totalorder %s44_s24, %s44_s24 }
   0xa   :  { %p547_p2 = scmp.lt.s32.totalorder %s545_s27, %s541_s3 }
   0xc   :  { %p548_p3 = por %p547_p2, %p546_p1 }
   0xe   :  { %p549_p4 = pnand %p548_p3, %p542_p0 }
  0x10   :  { %552 = shalt.err (!%p549_p4)
}
  0x11   :  { %46 = dma.hbm_to_vmem [thread:$0]  %s796_s2, 16, %s44_s24, [#allocation8]  }
  0x12   :  { %s561_s28 = scalar_lea.vmem %s70_s26, 16  ;;  %s565_s29 = scalar_lea.vmem %s70_s26, 32 }
  0x13   :  { %p562_p5 = scmp.ne.s32.totalorder %s70_s26, %s561_s28  ;;  %p566_p6 = scmp.lt.s32.totalorder %s70_s26, %s70_s26 }
  0x14   :  { %p567_p7 = scmp.lt.s32.totalorder %s565_s29, %s561_s28 }
  0x16   :  { %p568_p8 = por %p567_p7, %p566_p6 }
  0x18   :  { %p569_p9 = pnand %p568_p8, %p562_p5 }
  0x1a   :  { %572 = shalt.err (!%p569_p9)
}
  0x1b   :  { %72 = dma.hbm_to_vmem [thread:$0]  %s799_s6, 16, %s70_s26, [#allocation11]  }
  0x1c   :  { %s641_s13 = smov [#allocation5]   ;;  %s642_s15 = smov [#allocation9]  }
  0x1d   :  { %s33_s14 = sshll.u32 %s641_s13, 4  ;;  %s56_s16 = sshll.u32 %s642_s15, 4  ;;  %s34_s14 = int_to_ptr.vmem [resolvable:$true] %s33_s14  ;;  %s57_s16 = int_to_ptr.vmem [resolvable:$true] %s56_s16 }
  0x1e   :  { %s581_s17 = scalar_lea.vmem %s34_s14, 16  ;;  %s585_s2 = scalar_lea.vmem %s34_s14, 32 }
  0x1f   :  { %p582_p10 = scmp.ne.s32.totalorder %s34_s14, %s581_s17  ;;  %p586_p11 = scmp.lt.s32.totalorder %s34_s14, %s34_s14 }
  0x20   :  { %p587_p12 = scmp.lt.s32.totalorder %s585_s2, %s581_s17 }
  0x22   :  { %p588_p13 = por %p587_p12, %p586_p11 }
  0x24   :  { %p589_p0 = pnand %p588_p13, %p582_p10 }
  0x26   :  { %592 = shalt.err (!%p589_p0)
}
  0x27   :  { %36 = dma.hbm_to_vmem [thread:$0]  %s795_s1, 16, %s34_s14, [#allocation6]  }
  0x28   :  { %s601_s20 = scalar_lea.vmem %s57_s16, 384  ;;  %p606_p2 = scmp.lt.s32.totalorder %s57_s16, %s57_s16 }
  0x29   :  { %p602_p1 = scmp.ne.s32.totalorder %s57_s16, %s601_s20  ;;  %p607_p3 = scmp.lt.s32.totalorder %s601_s20, %s601_s20 }
  0x2b   :  { %p608_p4 = por %p607_p3, %p606_p2 }
  0x2d   :  { %p609_p5 = pnand %p608_p4, %p602_p1 }
  0x2f   :  { %612 = shalt.err (!%p609_p5)
}
  0x30   :  { %s643_s6 = smov 128   ;;  %s644_s21 = smov 8  }
  0x31   :  { %62 = dma.hbm_to_vmem [thread:$0]  %s798_s5, 384, %s57_s16, [#allocation8], %s643_s6, %s643_s6, %s644_s21  }
  0x32   :  { %s645_s24 = smov [#allocation12]  }
  0x33   :  { %s81_s25 = sshll.u32 %s645_s24, 4  ;;  %s82_s25 = int_to_ptr.vmem [resolvable:$true] %s81_s25 }
  0x34   :  { %s621_s26 = scalar_lea.vmem %s82_s25, 16  ;;  %s625_s3 = scalar_lea.vmem %s82_s25, 32 }
  0x35   :  { %p622_p6 = scmp.ne.s32.totalorder %s82_s25, %s621_s26  ;;  %p626_p7 = scmp.lt.s32.totalorder %s82_s25, %s82_s25 }
  0x36   :  { %p627_p8 = scmp.lt.s32.totalorder %s625_s3, %s621_s26 }
  0x38   :  { %p628_p9 = por %p627_p8, %p626_p7 }
  0x3a   :  { %p629_p10 = pnand %p628_p9, %p622_p6 }
  0x3c   :  { %632 = shalt.err (!%p629_p10)
}
  0x3d   :  { %84 = dma.hbm_to_vmem [thread:$0]  %s801_s8, 16, %s82_s25, [#allocation11]  }
  0x3e   :  { %633 = dma.done.wait [#allocation6], 16  }
  0x3f   :  { %634 = vsyncadd [#allocation6], 4294967280 }
  0x40   :  { %635 = dma.done.wait [#allocation8], 400  }
  0x41   :  { %636 = vsyncadd [#allocation8], 4294966896 }
  0x42   :  { %637 = dma.done.wait [#allocation11], 32  }
  0x43   :  { %638 = vsyncadd [#allocation11], 4294967264  ;;  %v126_v3 = vld [vmem:[#allocation9 + $0x10] sm:$0xff]  ;;  %v125_v4 = vld [vmem:[#allocation9 + $0x8] sm:$0xff]  ;;  %vm134_vm0 = vcmask 195584   ;;  %vm233_vm1 = vcmask 523264  }
  0x44   :  { %v124_v5 = vld [vmem:[#allocation9] sm:$0xff]  ;;  %479 = vmatprep.subr.mxu0 %v126_v3  ;;  %v441_v8 = vld [vmem:[#allocation5] ss:$0 sm:$0xff]  ;;  %v442_v11 = vld [vmem:[#allocation7] ss:$0 sm:$0xff]  ;;  %vm431_vm2 = vcmask 7168  }
  0x45   :  { %v104_v6 = vld [vmem:[%s794_s0] sm:$0xff]  ;;  %v105_v7 = vld [vmem:[%s794_s0 + $0x8] sm:$0xff]  ;;  %480 = vmatpush3.msra.mxu0 %v126_v3  ;;  %v225_v12 = vld [vmem:[%s800_s7 + $0x38] sm:$0xff] }
  0x46   :  { %v113_v9 = vsub.f32 %v104_v6, %v441_v8  ;;  %v114_v10 = vsub.f32 %v105_v7, %v441_v8  ;;  %v224_v13 = vld [vmem:[%s800_s7 + $0x30] sm:$0xff]  ;;  %481 = vmatprep.subr.mxu0 %v125_v4  ;;  %488 = vmatprep.subr.mxu1 %v225_v12  ;;  %v223_v16 = vld [vmem:[%s800_s7 + $0x28] sm:$0xff]  ;;  %v222_v17 = vld [vmem:[%s800_s7 + $0x20] sm:$0xff] }
  0x47   :  { %482 = vmatpush3.msra.mxu0 %v125_v4  ;;  %489 = vmatpush3.msra.mxu1 %v225_v12  ;;  %v221_v18 = vld [vmem:[%s800_s7 + $0x18] sm:$0xff]  ;;  %v220_v19 = vld [vmem:[%s800_s7 + $0x10] sm:$0xff]  ;;  %v219_v20 = vld [vmem:[%s800_s7 + $0x8] sm:$0xff] }
  0x48   :  { %v122_v14 = vmul.f32 %v442_v11, %v113_v9  ;;  %v123_v15 = vmul.f32 %v442_v11, %v114_v10  ;;  %483 = vmatprep.subr.mxu0 %v124_v5  ;;  %490 = vmatprep.subr.mxu1 %v224_v13  ;;  %v218_v21 = vld [vmem:[%s800_s7] sm:$0xff]  ;;  %v324_v22 = vld [vmem:[%s802_s9 + $0x38] sm:$0xff]  ;;  %v323_v23 = vld [vmem:[%s802_s9 + $0x30] sm:$0xff] }
  0x49   :  { %484 = vmatpush3.msra.mxu0 %v124_v5  ;;  %491 = vmatpush3.msra.mxu1 %v224_v13  ;;  %v322_v24 = vld [vmem:[%s802_s9 + $0x28] sm:$0xff]  ;;  %v321_v25 = vld [vmem:[%s802_s9 + $0x20] sm:$0xff]  ;;  %v443_v26 = vld [vmem:[#allocation10] ss:$0 sm:$0xff] }
  0x4a   :  { %485 = vmatprep.mubr.msk.f32.mxu0 %vm134_vm0, %v122_v14  ;;  %492 = vmatprep.subr.mxu1 %v223_v16  ;;  %v320_v33 = vld [vmem:[%s802_s9 + $0x18] sm:$0xff]  ;;  %v319_v34 = vld [vmem:[%s802_s9 + $0x10] sm:$0xff]  ;;  %v318_v35 = vld [vmem:[%s802_s9 + $0x8] sm:$0xff] }
  0x4b   :  { %486 = vmatmul.mubr.msk.f32.vlgmr.msra.gmra.mxu0 %vm134_vm0, %v123_v15  ;;  %493 = vmatpush3.msra.mxu1 %v223_v16  ;;  %v317_v36 = vld [vmem:[%s802_s9] sm:$0xff] }
  0x4c   :  { %494 = vmatprep.subr.mxu1 %v222_v17  ;;  %507 = vmatprep.subr.mxu0 %v324_v22  ;;  %v446_v37 = vld [vmem:[#allocation12] ss:$0 sm:$0xff]  ;;  %v449_v44 = vld [vmem:[#allocation4] ss:$0 sm:$0xff]  ;;  %v452_v46 = vld [vmem:[#allocation2] ss:$0 sm:$0xff] }
  0x4d   :  { %495 = vmatpush3.msra.mxu1 %v222_v17  ;;  %508 = vmatpush3.msra.mxu0 %v324_v22  ;;  %v453_v48 = vld [vmem:[#allocation3] ss:$0 sm:$0xff] }
  0x4e   :  { %496 = vmatprep.subr.mxu1 %v221_v18  ;;  %509 = vmatprep.subr.mxu0 %v323_v23 }
  0x4f   :  { %497 = vmatpush3.msra.mxu1 %v221_v18  ;;  %510 = vmatpush3.msra.mxu0 %v323_v23 }
  0x50   :  { %498 = vmatprep.subr.mxu1 %v220_v19  ;;  %511 = vmatprep.subr.mxu0 %v322_v24 }
  0x51   :  { %499 = vmatpush3.msra.mxu1 %v220_v19  ;;  %512 = vmatpush3.msra.mxu0 %v322_v24 }
  0x52   :  { %500 = vmatprep.subr.mxu1 %v219_v20  ;;  %513 = vmatprep.subr.mxu0 %v321_v25 }
  0x53   :  { %501 = vmatpush3.msra.mxu1 %v219_v20  ;;  %514 = vmatpush3.msra.mxu0 %v321_v25 }
  0x54   :  { %502 = vmatprep.subr.mxu1 %v218_v21  ;;  %515 = vmatprep.subr.mxu0 %v320_v33 }
  0x55   :  { %503 = vmatpush3.msra.mxu1 %v218_v21  ;;  %516 = vmatpush3.msra.mxu0 %v320_v33 }
  0x56   :  { %517 = vmatprep.subr.mxu0 %v319_v34 }
  0x57   :  { %518 = vmatpush3.msra.mxu0 %v319_v34 }
  0x58   :  { %519 = vmatprep.subr.mxu0 %v318_v35 }
  0x59   :  { %520 = vmatpush3.msra.mxu0 %v318_v35 }
  0x5a   :  { %521 = vmatprep.subr.mxu0 %v317_v36 }
  0x5b   :  { %522 = vmatpush3.msra.mxu0 %v317_v36 }
 0x10b   :  { %v487_v27 = vpop.f32.mrf.mxu0 }
 0x10c   :  { %v213_v28 = vadd.f32 %v487_v27, %v443_v26 }
 0x10d   :  { %v207_v29 = vpop.f32.mrf.mxu0 }
 0x10e   :  { %v208_v30 = vadd.f32 %v443_v26, %v207_v29  ;;  %v217_v32 = vmax.f32 %v213_v28, 0.0 }
 0x110   :  { %v216_v31 = vmax.f32 %v208_v30, 0.0 }
 0x112   :  { %504 = vmatprep.mubr.msk.f32.mxu1 %vm233_vm1, %v216_v31 }
 0x113   :  { %505 = vmatmul.mubr.msk.f32.vlgmr.msra.gmra.mxu1 %vm233_vm1, %v217_v32 }
 0x1d3   :  { %v506_v38 = vpop.f32.mrf.mxu1 }
 0x1d4   :  { %v312_v39 = vadd.f32 %v506_v38, %v446_v37 }
 0x1d5   :  { %v306_v40 = vpop.f32.mrf.mxu1 }
 0x1d6   :  { %v307_v41 = vadd.f32 %v446_v37, %v306_v40  ;;  %v316_v43 = vmax.f32 %v312_v39, 0.0 }
 0x1d8   :  { %v315_v42 = vmax.f32 %v307_v41, 0.0 }
 0x1da   :  { %523 = vmatprep.mubr.msk.f32.mxu0 %vm233_vm1, %v315_v42 }
 0x1db   :  { %524 = vmatmul.mubr.msk.f32.vlgmr.msra.gmra.mxu0 %vm233_vm1, %v316_v43 }
 0x29b   :  { %v525_v45 = vpop.f32.mrf.mxu0 }
 0x29c   :  { %v410_v47 = vadd.f32 %v525_v45, %v449_v44 }
 0x29d   :  { %v404_v49 = vpop.f32.mrf.mxu0 }
 0x29e   :  { %v421_v50 = vmul.f32 %v452_v46, %v410_v47  ;;  %v405_v51 = vadd.f32 %v449_v44, %v404_v49 }
 0x2a0   :  { %v430_v52 = vadd.f32 %v453_v48, %v421_v50  ;;  %v420_v53 = vmul.f32 %v452_v46, %v405_v51 }
 0x2a2   :  { %433 = vst.msk [vmem:[%s803_s11 + $0x8] sm:$0xff] %vm431_vm2, %v430_v52  ;;  %v429_v54 = vadd.f32 %v453_v48, %v420_v53 }
 0x2a4   :  { %432 = vst.msk [vmem:[%s803_s11] sm:$0xff] %vm431_vm2, %v429_v54 }
 0x2a5   :  { %438 = vsyncpa [#allocation6], 1 }
 0x2a6   :  { %439 = vsyncpa [#allocation8], 1 }
 0x2a7   :  { %440 = vsyncpa [#allocation11], 1 }

</bundles_post_ra>
